<compile_context>
chip_gen: v7x
topology: tpu7x:2x2x1
jax: 0.10.0
libtpu: 0.0.40
codegen_flags: <defaults>
</compile_context>

<pallas_src>
import jax
import jax.numpy as jnp
import numpy as np
from jax.experimental import pallas as pl
from jax.experimental.pallas import tpu as pltpu


def spatial_atten_kernel(atn_ref, coord_ref, m_ref, gf_ref, out_ref):
    # atn_ref:   (TB, C)       f32  Linear(instance_params)             (precomputed)
    # coord_ref: (TB, HWp)     f32  conv(coord channels) + conv bias    (precomputed)
    # m_ref:     (HWp, HWp)    f32  banded 5x5 conv operator            (precomputed)
    # gf_ref:    (TB, C, HWp)       lane-dense global features (native dtype)
    # out_ref:   (TB, C, HWp)
    gf = gf_ref[...]                               # single VMEM load, native dtype
    tb, C, hwp = gf.shape
    gf32 = gf.astype(jnp.float32)                  # fsum accumulates in f32 anyway

    # Channel-weighted sum: C VPU multiply-adds on full (TB, HWp) tiles.
    # (For large C, switch this to a batched (TB, C) x (C, HWp) contraction instead.)
    fsum = jnp.zeros((tb, hwp), jnp.float32)
    for c in range(C):                             # static unroll, C is small
        fsum = fsum + atn_ref[:, c:c + 1] * gf32[:, c, :]

    # 5x5 conv over fsum as ONE MXU matmul against the banded operator; the accumulator
    # starts from the precomputed coordinate-channel contribution (+ conv bias).
    conv = coord_ref[...] + jnp.dot(fsum, m_ref[...],
                                    preferred_element_type=jnp.float32)
    mask = jax.nn.sigmoid(conv)                    # (TB, HWp)  -> EUP

    # Final gate in gf's native dtype (bf16 VPU on v6e/v7x); lane-dense (TB, C, HWp) store.
    out_ref[...] = (gf * mask[:, None, :].astype(gf.dtype)).astype(out_ref.dtype)


def spatial_atten(global_features, instance_params, instance_inds,
                  w_atn, b_atn, w_conv, b_conv, *, tb=8):
    B, C, H, W = global_features.shape
    HW = H * W
    # torch.cat((fsum, relative_coords), dim=1) in the original requires n_inst == B.
    assert instance_inds.shape[0] == B
    f32 = jnp.float32
    dtype = global_features.dtype

    # ---- hoisted Linear: atn = instance_params @ W^T + b  -> (B, C) --------------------
    atn = instance_params.astype(f32) @ w_atn.astype(f32).T + b_atn.astype(f32)

    # ---- relative coords and their conv contribution (independent of gf) ---------------
    col = jnp.broadcast_to(jnp.arange(W, dtype=f32)[None, :], (H, W))
    row = jnp.broadcast_to(jnp.arange(H, dtype=f32)[:, None], (H, W))
    x_inst = instance_inds[:, 1].astype(f32)[:, None, None]       # flip([1]) -> (x, y)
    y_inst = instance_inds[:, 0].astype(f32)[:, None, None]
    coord_x = (x_inst - col[None]) / 32.0
    coord_y = (y_inst - row[None]) / 32.0
    coords = jnp.stack([coord_x, coord_y], axis=1)                # (B, 2, H, W)
    coord_bias = jax.lax.conv_general_dilated(
        coords, w_conv[:, 1:3].astype(f32), (1, 1), ((2, 2), (2, 2)),
        dimension_numbers=("NCHW", "OIHW", "NCHW"))
    coord_bias = (coord_bias + b_conv.astype(f32).reshape(1, 1, 1, 1)).reshape(B, HW)

    # ---- banded 5x5 conv operator M: conv_flat = fsum_flat @ M -------------------------
    # M[p, q] = w_conv[0, 0, dy+2, dx+2] where p is the source pixel of output pixel q
    # under tap (dy, dx); boundary (zero-padding) validity is folded in.
    ii = jnp.arange(H)[:, None]
    jj = jnp.arange(W)[None, :]
    q_idx = (ii * W + jj).reshape(HW)
    M = jnp.zeros((HW, HW), f32)
    for dy in range(-2, 3):
        for dx in range(-2, 3):
            valid = ((ii + dy >= 0) & (ii + dy < H) &
                     (jj + dx >= 0) & (jj + dx < W)).reshape(HW)
            p_idx = (jnp.clip(ii + dy, 0, H - 1) * W +
                     jnp.clip(jj + dx, 0, W - 1)).reshape(HW)
            w = w_conv[0, 0, dy + 2, dx + 2].astype(f32)
            M = M.at[p_idx, q_idx].add(jnp.where(valid, w, 0.0))
    # TODO(synk): for spatial sizes where HW*HW*4 bytes overflows the VMEM budget
    # (notably v7x's 64 MiB), fall back to a banded/tiled operator or a tap path.

    # ---- pad batch to a multiple of TB (sublanes) and HW to a multiple of 128 (lanes) ---
    TB = int(tb)
    B_pad = ((B + TB - 1) // TB) * TB
    HWp = ((HW + 127) // 128) * 128
    gf2 = global_features.reshape(B, C, HW)                       # lane-dense view
    if B_pad != B or HWp != HW:
        gf2 = jnp.pad(gf2, ((0, B_pad - B), (0, 0), (0, HWp - HW)))
        atn = jnp.pad(atn, ((0, B_pad - B), (0, 0)))
        coord_bias = jnp.pad(coord_bias, ((0, B_pad - B), (0, HWp - HW)))
        M = jnp.pad(M, ((0, HWp - HW), (0, HWp - HW)))

    itemsize = jnp.dtype(dtype).itemsize
    # VMEM budget: double-buffered gf in/out blocks + the (HWp, HWp) operator + slack.
    vmem_need = (4 * TB * C * HWp * itemsize + 2 * HWp * HWp * 4
                 + 4 * TB * (C + HWp) * 4 + (2 << 20))
    vmem_limit = int(min(max(2 * vmem_need, 16 << 20), 64 << 20))

    cost = pl.CostEstimate(
        flops=int(B_pad * HWp * (3 * C + 2 * HWp + 2)),
        transcendentals=int(B_pad * HWp),
        bytes_accessed=int(2 * B_pad * C * HWp * itemsize + HWp * HWp * 4
                           + B_pad * (C + HWp) * 4),
    )

    out2 = pl.pallas_call(
        spatial_atten_kernel,
        out_shape=jax.ShapeDtypeStruct((B_pad, C, HWp), dtype),
        grid=(B_pad // TB,),
        in_specs=[
            pl.BlockSpec((TB, C), lambda b: (b, 0)),              # atn        (B_pad, C)
            pl.BlockSpec((TB, HWp), lambda b: (b, 0)),            # coord_bias (B_pad, HWp)
            pl.BlockSpec((HWp, HWp), lambda b: (0, 0)),           # M          (HWp, HWp)
            pl.BlockSpec((TB, C, HWp), lambda b: (b, 0, 0)),      # gf2        (B_pad, C, HWp)
        ],
        out_specs=pl.BlockSpec((TB, C, HWp), lambda b: (b, 0, 0)),
        compiler_params=pltpu.CompilerParams(
            dimension_semantics=("parallel",),
            vmem_limit_bytes=vmem_limit),
        cost_estimate=cost,
    )(atn, coord_bias, M, gf2)

    return out2[:B, :, :HW].reshape(B, C, H, W)


def reference(gf, params, inds, w_atn, b_atn, w_conv, b_conv):
    """Pure-JAX reference matching the PyTorch forward."""
    B, C, H, W = gf.shape
    atn = params @ w_atn.T + b_atn                                    # (B, C)
    fsum = jnp.sum(gf * atn[:, :, None, None], axis=1, keepdims=True)  # (B,1,H,W)

    row = jnp.arange(H, dtype=jnp.float32)[:, None] * jnp.ones((1, W), jnp.float32)
    col = jnp.arange(W, dtype=jnp.float32)[None, :] * jnp.ones((H, 1), jnp.float32)
    x_inst = inds[:, 1].astype(jnp.float32)[:, None, None]
    y_inst = inds[:, 0].astype(jnp.float32)[:, None, None]
    coord_x = (x_inst - col[None]) / 32.0
    coord_y = (y_inst - row[None]) / 32.0
    feats = jnp.concatenate([fsum.astype(jnp.float32), coord_x[:, None], coord_y[:, None]],
                            axis=1)                                   # (B,3,H,W)

    conv = jax.lax.conv_general_dilated(
        feats, w_conv, window_strides=(1, 1), padding=((2, 2), (2, 2)),
        dimension_numbers=("NCHW", "OIHW", "NCHW")) + b_conv.reshape(1, 1, 1, 1)
    mask = jax.nn.sigmoid(conv)
    return gf * mask


if __name__ == "__main__":
    key = jax.random.PRNGKey(0)
    B, C, H, W = 2, 4, 16, 16        # batch=2, channels=4, spatial=16x16
    Cin = 4                          # in_channels of the Linear (= out_channels = C)

    k1, k2, k3, k4, k5, k6 = jax.random.split(key, 6)
    global_features = jax.random.normal(k1, (B, C, H, W), jnp.float32)
    instance_params = jax.random.normal(k2, (B, Cin), jnp.float32)
    instance_inds = jnp.array([[3, 5], [10, 7]], dtype=jnp.int32)   # (row, col) per instance

    # deterministic synthetic parameters (nn.Linear(Cin, C), nn.Conv2d(3, 1, 5, 1, 2))
    w_atn = jax.random.normal(k3, (C, Cin), jnp.float32) * 0.5
    b_atn = jax.random.normal(k4, (C,), jnp.float32) * 0.1
    w_conv = jax.random.normal(k5, (1, 3, 5, 5), jnp.float32) * 0.2
    b_conv = jax.random.normal(k6, (1,), jnp.float32) * 0.1

    out = spatial_atten(global_features, instance_params, instance_inds,
                        w_atn, b_atn, w_conv, b_conv)
    out = jax.block_until_ready(out)
    ref = reference(global_features, instance_params, instance_inds,
                    w_atn, b_atn, w_conv, b_conv)
    np.testing.assert_allclose(np.asarray(out), np.asarray(ref), rtol=1e-4, atol=1e-4)

    # Odd shapes: H != W, H*W not a multiple of 128, B not a multiple of TB
    # (exercises batch/lane zero-padding and boundary handling in M).
    B2, H2, W2 = 3, 8, 12
    g2 = jax.random.normal(k1, (B2, C, H2, W2), jnp.float32)
    p2 = jax.random.normal(k2, (B2, Cin), jnp.float32)
    i2 = jnp.array([[1, 2], [5, 9], [7, 0]], dtype=jnp.int32)
    out2 = jax.block_until_ready(spatial_atten(g2, p2, i2, w_atn, b_atn, w_conv, b_conv))
    ref2 = reference(g2, p2, i2, w_atn, b_atn, w_conv, b_conv)
    np.testing.assert_allclose(np.asarray(out2), np.asarray(ref2), rtol=1e-4, atol=1e-4)

    # bf16 global_features (native VPU/HBM dtype on v6e/v7x for the final gate).
    gbf = global_features.astype(jnp.bfloat16)
    out3 = jax.block_until_ready(spatial_atten(gbf, instance_params, instance_inds,
                                               w_atn, b_atn, w_conv, b_conv))
    ref3 = reference(gbf.astype(jnp.float32), instance_params, instance_inds,
                     w_atn, b_atn, w_conv, b_conv)
    np.testing.assert_allclose(np.asarray(out3.astype(jnp.float32)), np.asarray(ref3),
                               rtol=5e-2, atol=5e-2)

    print("KERNEL_OK")
</pallas_src>

<mosaic_0001>
module attributes {stable_mosaic.version = 11 : i64} {
  func.func @spatial_atten_kernel(%arg0: i32, %arg1: memref<8x4xf32, #tpu.memory_space<vmem>>, %arg2: memref<8x256xf32, #tpu.memory_space<vmem>>, %arg3: memref<256x256xf32, #tpu.memory_space<vmem>>, %arg4: memref<8x4x256xf32, #tpu.memory_space<vmem>>, %arg5: memref<8x4x256xf32, #tpu.memory_space<vmem>>) attributes {dimension_semantics = [#tpu.dimension_semantics<parallel>], iteration_bounds = array<i64: 1>, scalar_prefetch = 0 : i64, scratch_operands = 0 : i64, tpu.core_type = #tpu.core_type<tc>, window_params = [{transform_indices = @transform_0, window_bounds = array<i64: 8, 4>}, {transform_indices = @transform_1, window_bounds = array<i64: 8, 256>}, {pipeline_mode = #tpu.pipeline_mode<synchronous>, transform_indices = @transform_2, window_bounds = array<i64: 256, 256>}, {transform_indices = @transform_3, window_bounds = array<i64: 8, 4, 256>}, {transform_indices = @transform_4, window_bounds = array<i64: 8, 4, 256>}]} {
    %c0 = arith.constant 0 : index
    %c0_0 = arith.constant 0 : index
    %c0_1 = arith.constant 0 : index
    %0 = vector.load %arg4[%c0, %c0_0, %c0_1] : memref<8x4x256xf32, #tpu.memory_space<vmem>>, vector<8x4x256xf32>
    %cst = arith.constant 0.000000e+00 : f32
    %1 = vector.broadcast %cst : f32 to vector<8x256xf32>
    %c0_2 = arith.constant 0 : index
    %c0_3 = arith.constant 0 : index
    %2 = vector.load %arg1[%c0_2, %c0_3] : memref<8x4xf32, #tpu.memory_space<vmem>>, vector<8x1xf32>
    %3 = vector.extract_strided_slice %0 {offsets = [0, 0, 0], sizes = [8, 1, 256], strides = [1, 1, 1]} : vector<8x4x256xf32> to vector<8x1x256xf32>
    %4 = vector.shape_cast %3 : vector<8x1x256xf32> to vector<8x256xf32>
    %5 = vector.broadcast %2 : vector<8x1xf32> to vector<8x256xf32>
    %6 = arith.mulf %5, %4 : vector<8x256xf32>
    %7 = arith.addf %1, %6 : vector<8x256xf32>
    %c0_4 = arith.constant 0 : index
    %c1 = arith.constant 1 : index
    %8 = vector.load %arg1[%c0_4, %c1] : memref<8x4xf32, #tpu.memory_space<vmem>>, vector<8x1xf32>
    %9 = vector.extract_strided_slice %0 {offsets = [0, 1, 0], sizes = [8, 1, 256], strides = [1, 1, 1]} : vector<8x4x256xf32> to vector<8x1x256xf32>
    %10 = vector.shape_cast %9 : vector<8x1x256xf32> to vector<8x256xf32>
    %11 = vector.broadcast %8 : vector<8x1xf32> to vector<8x256xf32>
    %12 = arith.mulf %11, %10 : vector<8x256xf32>
    %13 = arith.addf %7, %12 : vector<8x256xf32>
    %c0_5 = arith.constant 0 : index
    %c2 = arith.constant 2 : index
    %14 = vector.load %arg1[%c0_5, %c2] : memref<8x4xf32, #tpu.memory_space<vmem>>, vector<8x1xf32>
    %15 = vector.extract_strided_slice %0 {offsets = [0, 2, 0], sizes = [8, 1, 256], strides = [1, 1, 1]} : vector<8x4x256xf32> to vector<8x1x256xf32>
    %16 = vector.shape_cast %15 : vector<8x1x256xf32> to vector<8x256xf32>
    %17 = vector.broadcast %14 : vector<8x1xf32> to vector<8x256xf32>
    %18 = arith.mulf %17, %16 : vector<8x256xf32>
    %19 = arith.addf %13, %18 : vector<8x256xf32>
    %c0_6 = arith.constant 0 : index
    %c3 = arith.constant 3 : index
    %20 = vector.load %arg1[%c0_6, %c3] : memref<8x4xf32, #tpu.memory_space<vmem>>, vector<8x1xf32>
    %21 = vector.extract_strided_slice %0 {offsets = [0, 3, 0], sizes = [8, 1, 256], strides = [1, 1, 1]} : vector<8x4x256xf32> to vector<8x1x256xf32>
    %22 = vector.shape_cast %21 : vector<8x1x256xf32> to vector<8x256xf32>
    %23 = vector.broadcast %20 : vector<8x1xf32> to vector<8x256xf32>
    %24 = arith.mulf %23, %22 : vector<8x256xf32>
    %25 = arith.addf %19, %24 : vector<8x256xf32>
    %c0_7 = arith.constant 0 : index
    %c0_8 = arith.constant 0 : index
    %26 = vector.load %arg2[%c0_7, %c0_8] : memref<8x256xf32, #tpu.memory_space<vmem>>, vector<8x256xf32>
    %c0_9 = arith.constant 0 : index
    %c0_10 = arith.constant 0 : index
    %27 = vector.load %arg3[%c0_9, %c0_10] : memref<256x256xf32, #tpu.memory_space<vmem>>, vector<256x256xf32>
    %cst_11 = arith.constant dense<0.000000e+00> : vector<8x256xf32>
    %28 = tpu.matmul %25, %27, %cst_11 {dimension_numbers = #tpu.dot_dimension_numbers<[1], [0], [0], [1], [0, 0, 1, 1], [], []>} : vector<8x256xf32>, vector<256x256xf32>, vector<8x256xf32> -> vector<8x256xf32>
    %29 = arith.addf %26, %28 : vector<8x256xf32>
    %30 = arith.negf %29 : vector<8x256xf32>
    %31 = math.exp %30 : vector<8x256xf32>
    %cst_12 = arith.constant 1.000000e+00 : f32
    %32 = vector.broadcast %cst_12 : f32 to vector<8x256xf32>
    %33 = arith.addf %32, %31 : vector<8x256xf32>
    %34 = arith.divf %32, %33 : vector<8x256xf32>
    %35 = vector.shape_cast %34 : vector<8x256xf32> to vector<8x1x256xf32>
    %36 = vector.broadcast %35 : vector<8x1x256xf32> to vector<8x4x256xf32>
    %37 = arith.mulf %0, %36 : vector<8x4x256xf32>
    %c0_13 = arith.constant 0 : index
    %c0_14 = arith.constant 0 : index
    %c0_15 = arith.constant 0 : index
    %38 = vector.load %arg5[%c0_13, %c0_14, %c0_15] : memref<8x4x256xf32, #tpu.memory_space<vmem>>, vector<8x4x256xf32>
    tpu.vector_store %arg5[%c0_13, %c0_14, %c0_15], %37 {strides = array<i32>} : memref<8x4x256xf32, #tpu.memory_space<vmem>>, vector<8x4x256xf32>,
    return
  }
  func.func @transform_0(%arg0: i32) -> (i32, i32) {
    %c0_i32 = arith.constant 0 : i32
    %c0_i32_0 = arith.constant 0 : i32
    return %arg0, %c0_i32 : i32, i32
  }
  func.func @transform_1(%arg0: i32) -> (i32, i32) {
    %c0_i32 = arith.constant 0 : i32
    %c0_i32_0 = arith.constant 0 : i32
    return %arg0, %c0_i32 : i32, i32
  }
  func.func @transform_2(%arg0: i32) -> (i32, i32) {
    %c0_i32 = arith.constant 0 : i32
    %c0_i32_0 = arith.constant 0 : i32
    %c0_i32_1 = arith.constant 0 : i32
    return %c0_i32, %c0_i32_0 : i32, i32
  }
  func.func @transform_3(%arg0: i32) -> (i32, i32, i32) {
    %c0_i32 = arith.constant 0 : i32
    %c0_i32_0 = arith.constant 0 : i32
    %c0_i32_1 = arith.constant 0 : i32
    return %arg0, %c0_i32, %c0_i32_0 : i32, i32, i32
  }
  func.func @transform_4(%arg0: i32) -> (i32, i32, i32) {
    %c0_i32 = arith.constant 0 : i32
    %c0_i32_0 = arith.constant 0 : i32
    %c0_i32_1 = arith.constant 0 : i32
    return %arg0, %c0_i32, %c0_i32_0 : i32, i32, i32
  }
}

</mosaic_0001>

<bundles_post_ra>
// kernel: tpu_custom_call.1
= control target key start
LH: loop header
LB: loop body
LE: loop exit
PB: predicated region body
PF: predicated region fallthrough
CT: control target
= control target key end

     0   :  { %9 = vsyncpa [#allocation3], 0  ;;  %s1295_s0 = inlined_call_operand.vmem [shape: f32[8,4], index: 0, kind: input, shape index: {}]   ;;  %s1296_s1 = inlined_call_operand.hbm [shape: f32[8,256], index: 1, kind: input, shape index: {}]   ;;  %s1297_s2 = inlined_call_operand.hbm [shape: f32[256,256], index: 2, kind: input, shape index: {}]   ;;  %s1298_s3 = inlined_call_operand.hbm [shape: f32[8,4,256], index: 3, kind: input, shape index: {}]   ;;  %s1299_s4 = inlined_call_operand.hbm [shape: f32[8,4,256], index: 4, kind: output, shape index: {}]  }
   0x1   :  { %10 = vsyncpa [#allocation6], 0 }
   0x2   :  { %11 = vsyncpa [#allocation4], 0  ;;  %s937_s15 = smov [#allocation5]   ;;  %s843_s19 = scalar_lea.hbm %s1297_s2, 8192 }
   0x3   :  { %s29_s16 = sshll.u32 %s937_s15, 4  ;;  %p844_p0 = scmp.ne.s32.totalorder %s1297_s2, %s843_s19  ;;  %s30_s16 = int_to_ptr.vmem [resolvable:$true] %s29_s16 }
   0x4   :  { %p847_p1 = scmp.lt.u32.totalorder %s843_s19, %s1297_s2 }
   0x6   :  { %p849_p2 = pnand %p847_p1, %p844_p0 }
   0x8   :  { %852 = shalt.err (!%p849_p2)
}
   0x9   :  { %s853_s24 = scalar_lea.vmem %s30_s16, 8192  ;;  %p858_p4 = scmp.lt.s32.totalorder %s30_s16, %s30_s16 }
   0xa   :  { %p854_p3 = scmp.ne.s32.totalorder %s30_s16, %s853_s24  ;;  %p859_p5 = scmp.lt.s32.totalorder %s853_s24, %s853_s24 }
   0xc   :  { %p860_p6 = por %p859_p5, %p858_p4 }
   0xe   :  { %p861_p7 = pnand %p860_p6, %p854_p3 }
  0x10   :  { %864 = shalt.err (!%p861_p7)
}
  0x11   :  { %s938_s25 = smov 256   ;;  %s939_s26 = smov 16  }
  0x12   :  { %35 = dma.hbm_to_vmem [thread:$0]  %s1297_s2, 8192, %s30_s16, [#allocation6], %s938_s25, %s938_s25, %s939_s26  }
  0x13   :  { %s940_s29 = smov [#allocation2]   ;;  %s941_s5 = smov [#allocation7]  }
  0x14   :  { %s20_s30 = sshll.u32 %s940_s29, 4  ;;  %s41_s6 = sshll.u32 %s941_s5, 4  ;;  %s21_s30 = int_to_ptr.vmem [resolvable:$true] %s20_s30  ;;  %s42_s6 = int_to_ptr.vmem [resolvable:$true] %s41_s6 }
  0x15   :  { %s865_s9 = scalar_lea.hbm %s1296_s1, 256 }
  0x16   :  { %p866_p8 = scmp.ne.s32.totalorder %s1296_s1, %s865_s9  ;;  %p869_p9 = scmp.lt.u32.totalorder %s865_s9, %s1296_s1 }
  0x18   :  { %p871_p10 = pnand %p869_p9, %p866_p8 }
  0x1a   :  { %874 = shalt.err (!%p871_p10)
}
  0x1b   :  { %s875_s2 = scalar_lea.vmem %s21_s30, 256  ;;  %p880_p12 = scmp.lt.s32.totalorder %s21_s30, %s21_s30 }
  0x1c   :  { %p876_p11 = scmp.ne.s32.totalorder %s21_s30, %s875_s2  ;;  %p881_p13 = scmp.lt.s32.totalorder %s875_s2, %s875_s2 }
  0x1e   :  { %p882_p0 = por %p881_p13, %p880_p12 }
  0x20   :  { %p883_p1 = pnand %p882_p0, %p876_p11 }
  0x22   :  { %886 = shalt.err (!%p883_p1)
}
  0x23   :  { %23 = dma.hbm_to_vmem [thread:$0]  %s1296_s1, 256, %s21_s30, [#allocation3]  }
  0x24   :  { %s887_s18 = scalar_lea.hbm %s1298_s3, 1024 }
  0x25   :  { %p888_p2 = scmp.ne.s32.totalorder %s1298_s3, %s887_s18  ;;  %p891_p3 = scmp.lt.u32.totalorder %s887_s18, %s1298_s3 }
  0x27   :  { %p893_p4 = pnand %p891_p3, %p888_p2 }
  0x29   :  { %896 = shalt.err (!%p893_p4)
}
  0x2a   :  { %s897_s23 = scalar_lea.vmem %s42_s6, 1024  ;;  %p902_p6 = scmp.lt.s32.totalorder %s42_s6, %s42_s6 }
  0x2b   :  { %p898_p5 = scmp.ne.s32.totalorder %s42_s6, %s897_s23  ;;  %p903_p7 = scmp.lt.s32.totalorder %s897_s23, %s897_s23 }
  0x2d   :  { %p904_p8 = por %p903_p7, %p902_p6 }
  0x2f   :  { %p905_p9 = pnand %p904_p8, %p898_p5 }
  0x31   :  { %908 = shalt.err (!%p905_p9)
}
  0x32   :  { %s942_s1 = smov 128   ;;  %s943_s24 = smov 8  }
  0x33   :  { %47 = dma.hbm_to_vmem [thread:$0]  %s1298_s3, 1024, %s42_s6, [#allocation6], %s942_s1, %s942_s1, %s943_s24  }
  0x34   :  { %931 = dma.done.wait [#allocation3], 256  }
  0x35   :  { %932 = vsyncadd [#allocation3], 4294967040 }
  0x36   :  { %933 = dma.done.wait [#allocation6], 9216  }
  0x37   :  { %934 = vsyncadd [#allocation6], 4294958080  ;;  %v944_v0 = vmov 0   ;;  %v945_v1 = vmov 2   ;;  %v65_v2 = vld [vmem:[%s1295_s0] sm:$0xff]  ;;  %v439_v4 = vld [vmem:[#allocation5 + $0x18] sm:$0xff] }
  0x38   :  { %830 = vset.pattern.permute.xlu0 %v944_v0  ;;  %832 = vset.pattern.permute.xlu1 %v945_v1  ;;  %v437_v3 = vld [vmem:[#allocation5 + $0x8] sm:$0xff]  ;;  %v436_v6 = vld [vmem:[#allocation5] sm:$0xff]  ;;  %v438_v7 = vld [vmem:[#allocation5 + $0x10] sm:$0xff]  ;;  %v946_v17 = vmov 1   ;;  %v947_v18 = vmov 3   ;;  %vm143_vm0 = vcmask 1041409  }
  0x39   :  { %68 = vperm.xlu0 %830, %v65_v2   ;;  %259 = vperm.xlu1 %832, %v65_v2   ;;  %v753_v5 = vpack.c.bf16 %v439_v4, %v437_v3  ;;  %v441_v8 = vld [vmem:[#allocation5 + $0x28] sm:$0xff]  ;;  %v755_v9 = vpack.c.bf16 %v438_v7, %v436_v6  ;;  %v443_v10 = vld [vmem:[#allocation5 + $0x38] sm:$0xff]  ;;  %v440_v11 = vld [vmem:[#allocation5 + $0x20] sm:$0xff]  ;;  %vm145_vm1 = vcmask 1042434   ;;  %vm147_vm2 = vcmask 1043459   ;;  %s949_s0 = smov [#allocation8]  }
  0x3a   :  { %v442_v12 = vld [vmem:[#allocation5 + $0x30] sm:$0xff]  ;;  %v757_v13 = vpack.c.bf16 %v443_v10, %v441_v8  ;;  %v445_v14 = vld [vmem:[#allocation5 + $0x48] sm:$0xff]  ;;  %v447_v15 = vld [vmem:[#allocation5 + $0x58] sm:$0xff]  ;;  %vm149_vm3 = vcmask 1044484   ;;  %vm151_vm4 = vcmask 1045509   ;;  %vm153_vm5 = vcmask 1046534  }
  0x3b   :  { %754 = vmatprep.subr.bf16.mxu0 %v753_v5  ;;  %v759_v16 = vpack.c.bf16 %v442_v12, %v440_v11  ;;  %v761_v19 = vpack.c.bf16 %v447_v15, %v445_v14  ;;  %v444_v20 = vld [vmem:[#allocation5 + $0x40] sm:$0xff]  ;;  %v446_v21 = vld [vmem:[#allocation5 + $0x50] sm:$0xff]  ;;  %v449_v22 = vld [vmem:[#allocation5 + $0x68] sm:$0xff]  ;;  %vm155_vm6 = vcmask 1047559   ;;  %s738_s3 = sshll.u32 %s949_s0, 4  ;;  %s739_s3 = int_to_ptr.vmem [resolvable:$true] %s738_s3 }
  0x3c   :  { %756 = vmatpush1.bf16.msra.mxu0 %v755_v9  ;;  %v451_v23 = vld [vmem:[#allocation5 + $0x78] sm:$0xff]  ;;  %v763_v24 = vpack.c.bf16 %v446_v21, %v444_v20  ;;  %v448_v26 = vld [vmem:[#allocation5 + $0x60] sm:$0xff]  ;;  %v450_v27 = vld [vmem:[#allocation5 + $0x70] sm:$0xff]  ;;  %s909_s29 = scalar_lea.vmem %s739_s3, 1024  ;;  %p914_p11 = scmp.lt.s32.totalorder %s739_s3, %s739_s3 }
  0x3d   :  { %831 = vset.pattern.permute.xlu0 %v946_v17  ;;  %833 = vset.pattern.permute.xlu1 %v947_v18  ;;  %v765_v25 = vpack.c.bf16 %v451_v23, %v449_v22  ;;  %v453_v28 = vld [vmem:[#allocation5 + $0x88] sm:$0xff]  ;;  %v455_v29 = vld [vmem:[#allocation5 + $0x98] sm:$0xff]  ;;  %v767_v30 = vpack.c.bf16 %v450_v27, %v448_v26  ;;  %v452_v32 = vld [vmem:[#allocation5 + $0x80] sm:$0xff]  ;;  %p910_p10 = scmp.ne.s32.totalorder %s739_s3, %s909_s29  ;;  %p915_p12 = scmp.lt.s32.totalorder %s909_s29, %s909_s29 }
  0x3e   :  { %171 = vperm.xlu0 %831, %v65_v2   ;;  %347 = vperm.xlu1 %833, %v65_v2   ;;  %v769_v31 = vpack.c.bf16 %v455_v29, %v453_v28  ;;  %v454_v33 = vld [vmem:[#allocation5 + $0x90] sm:$0xff]  ;;  %v457_v34 = vld [vmem:[#allocation5 + $0xa8] sm:$0xff]  ;;  %v459_v35 = vld [vmem:[#allocation5 + $0xb8] sm:$0xff] }
  0x3f   :  { %758 = vmatprep.subr.bf16.mxu0 %v757_v13  ;;  %v771_v36 = vpack.c.bf16 %v454_v33, %v452_v32  ;;  %v773_v37 = vpack.c.bf16 %v459_v35, %v457_v34  ;;  %v456_v38 = vld [vmem:[#allocation5 + $0xa0] sm:$0xff]  ;;  %v458_v39 = vld [vmem:[#allocation5 + $0xb0] sm:$0xff]  ;;  %v461_v40 = vld [vmem:[#allocation5 + $0xc8] sm:$0xff]  ;;  %p916_p13 = por %p915_p12, %p914_p11 }
  0x40   :  { %760 = vmatpush1.bf16.msra.mxu0 %v759_v16  ;;  %v463_v41 = vld [vmem:[#allocation5 + $0xd8] sm:$0xff]  ;;  %v775_v42 = vpack.c.bf16 %v458_v39, %v456_v38  ;;  %v460_v44 = vld [vmem:[#allocation5 + $0xc0] sm:$0xff]  ;;  %v462_v45 = vld [vmem:[#allocation5 + $0xd0] sm:$0xff] }
  0x41   :  { %762 = vmatprep.subr.bf16.mxu0 %v761_v19  ;;  %v777_v43 = vpack.c.bf16 %v463_v41, %v461_v40  ;;  %v465_v46 = vld [vmem:[#allocation5 + $0xe8] sm:$0xff]  ;;  %v467_v47 = vld [vmem:[#allocation5 + $0xf8] sm:$0xff]  ;;  %v779_v48 = vpack.c.bf16 %v462_v45, %v460_v44  ;;  %v464_v50 = vld [vmem:[#allocation5 + $0xe0] sm:$0xff]  ;;  %p917_p0 = pnand %p916_p13, %p910_p10 }
  0x42   :  { %834 = vset.pattern.permute.xlu0 %v947_v18  ;;  %v781_v49 = vpack.c.bf16 %v467_v47, %v465_v46  ;;  %v466_v51 = vld [vmem:[#allocation5 + $0xf0] sm:$0xff]  ;;  %v469_v52 = vld [vmem:[#allocation5 + $0x108] sm:$0xff]  ;;  %v471_v53 = vld [vmem:[#allocation5 + $0x118] sm:$0xff] }
  0x43   :  { %v783_v54 = vpack.c.bf16 %v466_v51, %v464_v50  ;;  %v785_v55 = vpack.c.bf16 %v471_v53, %v469_v52  ;;  %v468_v56 = vld [vmem:[#allocation5 + $0x100] sm:$0xff]  ;;  %v470_v57 = vld [vmem:[#allocation5 + $0x110] sm:$0xff]  ;;  %v473_v58 = vld [vmem:[#allocation5 + $0x128] sm:$0xff] }
  0x44   :  { %764 = vmatpush1.bf16.msra.mxu0 %v763_v24  ;;  %v475_v59 = vld [vmem:[#allocation5 + $0x138] sm:$0xff]  ;;  %v787_v60 = vpack.c.bf16 %v470_v57, %v468_v56  ;;  %v472_v62 = vld [vmem:[#allocation5 + $0x120] sm:$0xff]  ;;  %v474_v63 = vld [vmem:[#allocation5 + $0x130] sm:$0xff] }
  0x45   :  { %766 = vmatprep.subr.bf16.mxu0 %v765_v25  ;;  %v789_v61 = vpack.c.bf16 %v475_v59, %v473_v58  ;;  %v477_v0 = vld [vmem:[#allocation5 + $0x148] sm:$0xff]  ;;  %v479_v1 = vld [vmem:[#allocation5 + $0x158] sm:$0xff]  ;;  %v791_v2 = vpack.c.bf16 %v474_v63, %v472_v62  ;;  %v476_v4 = vld [vmem:[#allocation5 + $0x140] sm:$0xff] }
  0x46   :  { %v793_v3 = vpack.c.bf16 %v479_v1, %v477_v0  ;;  %v478_v5 = vld [vmem:[#allocation5 + $0x150] sm:$0xff]  ;;  %v481_v6 = vld [vmem:[#allocation5 + $0x168] sm:$0xff]  ;;  %v483_v7 = vld [vmem:[#allocation5 + $0x178] sm:$0xff] }
  0x47   :  { %v795_v8 = vpack.c.bf16 %v478_v5, %v476_v4  ;;  %v797_v9 = vpack.c.bf16 %v483_v7, %v481_v6  ;;  %v480_v10 = vld [vmem:[#allocation5 + $0x160] sm:$0xff]  ;;  %v482_v11 = vld [vmem:[#allocation5 + $0x170] sm:$0xff]  ;;  %v485_v12 = vld [vmem:[#allocation5 + $0x188] sm:$0xff] }
  0x48   :  { %768 = vmatpush1.bf16.msra.mxu0 %v767_v30  ;;  %v487_v13 = vld [vmem:[#allocation5 + $0x198] sm:$0xff]  ;;  %v799_v14 = vpack.c.bf16 %v482_v11, %v480_v10  ;;  %v484_v16 = vld [vmem:[#allocation5 + $0x180] sm:$0xff]  ;;  %v486_v17 = vld [vmem:[#allocation5 + $0x190] sm:$0xff] }
  0x49   :  { %770 = vmatprep.subr.bf16.mxu0 %v769_v31  ;;  %v801_v15 = vpack.c.bf16 %v487_v13, %v485_v12  ;;  %v489_v18 = vld [vmem:[#allocation5 + $0x1a8] sm:$0xff]  ;;  %v491_v19 = vld [vmem:[#allocation5 + $0x1b8] sm:$0xff]  ;;  %v803_v20 = vpack.c.bf16 %v486_v17, %v484_v16  ;;  %v488_v22 = vld [vmem:[#allocation5 + $0x1a0] sm:$0xff] }
  0x4a   :  { %v805_v21 = vpack.c.bf16 %v491_v19, %v489_v18  ;;  %v490_v23 = vld [vmem:[#allocation5 + $0x1b0] sm:$0xff]  ;;  %v493_v24 = vld [vmem:[#allocation5 + $0x1c8] sm:$0xff]  ;;  %v495_v25 = vld [vmem:[#allocation5 + $0x1d8] sm:$0xff] }
  0x4b   :  { %v807_v26 = vpack.c.bf16 %v490_v23, %v488_v22  ;;  %v809_v27 = vpack.c.bf16 %v495_v25, %v493_v24  ;;  %v492_v28 = vld [vmem:[#allocation5 + $0x1c0] sm:$0xff]  ;;  %v494_v29 = vld [vmem:[#allocation5 + $0x1d0] sm:$0xff]  ;;  %v497_v30 = vld [vmem:[#allocation5 + $0x1e8] sm:$0xff] }
  0x4c   :  { %772 = vmatpush1.bf16.msra.mxu0 %v771_v36  ;;  %v499_v31 = vld [vmem:[#allocation5 + $0x1f8] sm:$0xff]  ;;  %v811_v32 = vpack.c.bf16 %v494_v29, %v492_v28  ;;  %v496_v34 = vld [vmem:[#allocation5 + $0x1e0] sm:$0xff]  ;;  %v498_v35 = vld [vmem:[#allocation5 + $0x1f0] sm:$0xff] }
  0x4d   :  { %774 = vmatprep.subr.bf16.mxu0 %v773_v37  ;;  %v813_v33 = vpack.c.bf16 %v499_v31, %v497_v30  ;;  %v815_v36 = vpack.c.bf16 %v498_v35, %v496_v34  ;;  %v79_v37 = vlaneseq  ;;  %v1025_v41 = vld [vmem:[#allocation7] sm:$0xff]  ;;  %v1058_v59 = vld [vmem:[#allocation7 + $0x28] sm:$0xff] }
  0x4e   :  { %v1047_v53 = vld [vmem:[#allocation7 + $0x20] sm:$0xff] }
  0x4f   :  { %v1017_v38 = vshrl.u32 %v79_v37, 7 }
  0x50   :  { %776 = vmatpush1.bf16.msra.mxu0 %v775_v42  ;;  %v1027_v42 = vld [vmem:[#allocation7 + $0x8] sm:$0xff] }
  0x51   :  { %778 = vmatprep.subr.bf16.mxu0 %v777_v43  ;;  %v1020_v39 = vsub.s32 0, %v1017_v38  ;;  %v1023_v40 = vsub.s32 4, %v1017_v38  ;;  %v1029_v43 = vld [vmem:[#allocation7 + $0x10] sm:$0xff]  ;;  %v1056_v58 = vsub.s32 2, %v1017_v38  ;;  %v1068_v0 = vsub.s32 6, %v1017_v38 }
  0x52   :  { %v1071_v1 = vsub.s32 1, %v1017_v38  ;;  %v1077_v4 = vsub.s32 5, %v1017_v38  ;;  %v1084_v7 = vsub.s32 3, %v1017_v38 }
  0x53   :  { %v82_v44 = vrot.slane %v1025_v41, %v1020_v39  ;;  %v90_v45 = vrot.slane %v1027_v42, %v1020_v39  ;;  %v86_v46 = vrot.slane %v1025_v41, %v1023_v40  ;;  %v94_v47 = vrot.slane %v1027_v42, %v1023_v40 }
  0x54   :  { %780 = vmatpush1.bf16.msra.mxu0 %v779_v48  ;;  %v1039_v48 = vld [vmem:[#allocation7 + $0x18] sm:$0xff]  ;;  %v102_v50 = vrot.slane %v1029_v43, %v1023_v40  ;;  %v118_v62 = vrot.slane %v1047_v53, %v1023_v40  ;;  %v122_v5 = vrot.slane %v1058_v59, %v1020_v39  ;;  %v265_v6 = vrot.slane %v1025_v41, %v1056_v58 }
  0x55   :  { %782 = vmatprep.subr.bf16.mxu0 %v781_v49  ;;  %v98_v49 = vrot.slane %v1029_v43, %v1020_v39  ;;  %v144_v51 = vsel %vm143_vm0, %v90_v45, %v82_v44  ;;  %v157_v52 = vsel %vm143_vm0, %v94_v47, %v86_v46  ;;  %v269_v16 = vrot.slane %v1025_v41, %v1068_v0 }
  0x56   :  { %v158_v57 = vsel %vm145_vm1, %v102_v50, %v157_v52  ;;  %v177_v17 = vrot.slane %v1025_v41, %v1071_v1  ;;  %v181_v18 = vrot.slane %v1025_v41, %v1077_v4  ;;  %v185_v19 = vrot.slane %v1027_v42, %v1071_v1 }
  0x57   :  { %v146_v56 = vsel %vm145_vm1, %v98_v49, %v144_v51  ;;  %v273_v22 = vrot.slane %v1027_v42, %v1056_v58  ;;  %v277_v23 = vrot.slane %v1027_v42, %v1068_v0  ;;  %v281_v24 = vrot.slane %v1029_v43, %v1056_v58 }
  0x58   :  { %784 = vmatpush1.bf16.msra.mxu0 %v783_v54  ;;  %v106_v54 = vrot.slane %v1039_v48, %v1020_v39  ;;  %v353_v25 = vrot.slane %v1025_v41, %v1084_v7  ;;  %v285_v30 = vrot.slane %v1029_v43, %v1068_v0  ;;  %v193_v31 = vrot.slane %v1029_v43, %v1071_v1 }
  0x59   :  { %786 = vmatprep.subr.bf16.mxu0 %v785_v55  ;;  %v110_v55 = vrot.slane %v1039_v48, %v1023_v40  ;;  %v289_v34 = vrot.slane %v1039_v48, %v1056_v58  ;;  %v238_v35 = vsel %vm143_vm0, %v185_v19, %v177_v17  ;;  %v326_v37 = vsel %vm143_vm0, %v273_v22, %v265_v6 }
  0x5a   :  { %v148_v63 = vsel %vm147_vm2, %v106_v54, %v146_v56  ;;  %v333_v44 = vsel %vm143_vm0, %v277_v23, %v269_v16  ;;  %v369_v45 = vrot.slane %v1029_v43, %v1084_v7  ;;  %v201_v47 = vrot.slane %v1039_v48, %v1071_v1 }
  0x5b   :  { %v205_v49 = vrot.slane %v1039_v48, %v1077_v4  ;;  %v293_v54 = vrot.slane %v1039_v48, %v1068_v0 }
  0x5c   :  { %788 = vmatpush1.bf16.msra.mxu0 %v787_v60  ;;  %v114_v60 = vrot.slane %v1047_v53, %v1020_v39 }
  0x5d   :  { %790 = vmatprep.subr.bf16.mxu0 %v789_v61  ;;  %v1062_v61 = vld [vmem:[#allocation7 + $0x30] sm:$0xff] }
  0x5e   :  { %v130_v10 = vrot.slane %v1062_v61, %v1020_v39  ;;  %v134_v11 = vrot.slane %v1062_v61, %v1023_v40  ;;  %v150_v12 = vsel %vm149_vm3, %v114_v60, %v148_v63  ;;  %v334_v60 = vsel %vm145_vm1, %v285_v30, %v333_v44 }
  0x5f   :  { %v335_v17 = vsel %vm147_vm2, %v293_v54, %v334_v60  ;;  %v393_v30 = vrot.slane %v1058_v59, %v1084_v7  ;;  %v317_v44 = vrot.slane %v1062_v61, %v1068_v0 }
  0x60   :  { %792 = vmatpush1.bf16.msra.mxu0 %v791_v2  ;;  %v1073_v2 = vld [vmem:[#allocation7 + $0x38] sm:$0xff] }
  0x61   :  { %794 = vmatprep.subr.bf16.mxu0 %v793_v3  ;;  %v159_v3 = vsel %vm147_vm2, %v110_v55, %v158_v57  ;;  %v138_v13 = vrot.slane %v1073_v2, %v1020_v39  ;;  %v239_v55 = vsel %vm145_vm1, %v193_v31, %v238_v35  ;;  %v327_v57 = vsel %vm145_vm1, %v281_v24, %v326_v37 }
  0x62   :  { %v328_v16 = vsel %vm147_vm2, %v289_v34, %v327_v57  ;;  %v305_v24 = vrot.slane %v1058_v59, %v1056_v58  ;;  %v229_v34 = vrot.slane %v1062_v61, %v1077_v4  ;;  %v313_v37 = vrot.slane %v1062_v61, %v1056_v58 }
  0x63   :  { %v233_v54 = vrot.slane %v1073_v2, %v1071_v1 }
  0x64   :  { %796 = vmatpush1.bf16.msra.mxu0 %v795_v8  ;;  %v1087_v8 = vsub.s32 7, %v1017_v38 }
  0x65   :  { %798 = vmatprep.subr.bf16.mxu0 %v797_v9  ;;  %v126_v9 = vrot.slane %v1058_v59, %v1023_v40 }
  0x66   :  { %v365_v28 = vrot.slane %v1027_v42, %v1087_v8  ;;  %v373_v46 = vrot.slane %v1029_v43, %v1087_v8  ;;  %v381_v63 = vrot.slane %v1039_v48, %v1087_v8  ;;  %v389_v19 = vrot.slane %v1047_v53, %v1087_v8 }
  0x67   :  { %v397_v31 = vrot.slane %v1058_v59, %v1087_v8 }
  0x68   :  { %800 = vmatpush1.bf16.msra.mxu0 %v799_v14  ;;  %v142_v14 = vrot.slane %v1073_v2, %v1023_v40 }
  0x69   :  { %802 = vmatprep.subr.bf16.mxu0 %v801_v15  ;;  %v160_v15 = vsel %vm149_vm3, %v118_v62, %v159_v3  ;;  %v377_v62 = vrot.slane %v1039_v48, %v1084_v7  ;;  %v209_v3 = vrot.slane %v1047_v53, %v1071_v1 }
  0x6a   :  { %v161_v29 = vsel %vm151_vm4, %v126_v9, %v160_v15 }
  0x6b   :  { %v1153_v52 = vsel %vm153_vm5, %v134_v11, %v161_v29  ;;  %v301_v11 = vrot.slane %v1047_v53, %v1068_v0 }
  0x6c   :  { %804 = vmatpush1.bf16.msra.mxu0 %v803_v20  ;;  %v189_v20 = vrot.slane %v1027_v42, %v1077_v4 }
  0x6d   :  { %806 = vmatprep.subr.bf16.mxu0 %v805_v21  ;;  %v152_v21 = vsel %vm151_vm4, %v122_v5, %v150_v12  ;;  %v213_v5 = vrot.slane %v1047_v53, %v1077_v4  ;;  %v240_v12 = vsel %vm147_vm2, %v201_v47, %v239_v55  ;;  %v336_v29 = vsel %vm149_vm3, %v301_v11, %v335_v17 }
  0x6e   :  { %v237_v55 = vrot.slane %v1073_v2, %v1077_v4  ;;  %v413_v11 = vrot.slane %v1073_v2, %v1087_v8 }
  0x70   :  { %808 = vmatpush1.bf16.msra.mxu0 %v807_v26  ;;  %v357_v26 = vrot.slane %v1025_v41, %v1087_v8 }
  0x71   :  { %810 = vmatprep.subr.bf16.mxu0 %v809_v27  ;;  %v361_v27 = vrot.slane %v1027_v42, %v1084_v7 }
  0x72   :  { %v421_v51 = vsel %vm143_vm0, %v365_v28, %v357_v26  ;;  %v241_v26 = vsel %vm149_vm3, %v209_v3, %v240_v12  ;;  %v325_v3 = vrot.slane %v1073_v2, %v1068_v0 }
  0x73   :  { %v414_v50 = vsel %vm143_vm0, %v361_v27, %v353_v25  ;;  %v422_v9 = vsel %vm145_vm1, %v373_v46, %v421_v51  ;;  %v309_v25 = vrot.slane %v1058_v59, %v1068_v0  ;;  %v405_v51 = vrot.slane %v1062_v61, %v1087_v8 }
  0x74   :  { %812 = vmatpush1.bf16.msra.mxu0 %v811_v32  ;;  %v197_v32 = vrot.slane %v1029_v43, %v1077_v4  ;;  %v415_v6 = vsel %vm145_vm1, %v369_v45, %v414_v50  ;;  %v423_v23 = vsel %vm147_vm2, %v381_v63, %v422_v9  ;;  %v401_v50 = vrot.slane %v1062_v61, %v1084_v7 }
  0x75   :  { %814 = vmatprep.subr.bf16.mxu0 %v813_v33  ;;  %v1134_v33 = vsel %vm153_vm5, %v130_v10, %v152_v21  ;;  %v297_v10 = vrot.slane %v1047_v53, %v1056_v58  ;;  %v221_v21 = vrot.slane %v1058_v59, %v1077_v4  ;;  %v416_v22 = vsel %vm147_vm2, %v377_v62, %v415_v6 }
  0x76   :  { %v321_v63 = vrot.slane %v1073_v2, %v1056_v58  ;;  %v156_v0 = vsel %vm155_vm6, %v138_v13, %v1134_v33 }
  0x77   :  { %v329_v28 = vsel %vm149_vm3, %v297_v10, %v328_v16  ;;  %v409_v10 = vrot.slane %v1073_v2, %v1084_v7 }
  0x78   :  { %816 = vmatpush1.bf16.msra.mxu0 %v815_v36  ;;  %v245_v36 = vsel %vm143_vm0, %v189_v20, %v181_v18  ;;  %v385_v18 = vrot.slane %v1047_v53, %v1084_v7  ;;  %v217_v20 = vrot.slane %v1058_v59, %v1071_v1  ;;  %v330_v47 = vsel %vm151_vm4, %v305_v24, %v329_v28 }
  0x79   :  { %v246_v56 = vsel %vm145_vm1, %v197_v32, %v245_v36  ;;  %v225_v32 = vrot.slane %v1062_v61, %v1071_v1  ;;  %v424_v36 = vsel %vm149_vm3, %v389_v19, %v423_v23  ;;  %v331_v9 = vsel %vm153_vm5, %v313_v37, %v330_v47 }
  0x7a   :  { %v247_v15 = vsel %vm147_vm2, %v205_v49, %v246_v56  ;;  %v417_v35 = vsel %vm149_vm3, %v385_v18, %v416_v22  ;;  %v242_v45 = vsel %vm151_vm4, %v217_v20, %v241_v26  ;;  %v337_v49 = vsel %vm151_vm4, %v309_v25, %v336_v29 }
  0x7b   :  { %v248_v27 = vsel %vm149_vm3, %v213_v5, %v247_v15  ;;  %v418_v56 = vsel %vm151_vm4, %v393_v30, %v417_v35  ;;  %v425_v57 = vsel %vm151_vm4, %v397_v31, %v424_v36  ;;  %v243_v5 = vsel %vm153_vm5, %v225_v32, %v242_v45  ;;  %v434_v31 = vld [vmem:[#allocation2] sm:$0xff]  ;;  %v435_v32 = vld [vmem:[#allocation2 + $0x8] sm:$0xff] }
  0x7c   :  { %v249_v46 = vsel %vm151_vm4, %v221_v21, %v248_v27  ;;  %v338_v4 = vsel %vm153_vm5, %v317_v44, %v337_v49  ;;  %v419_v12 = vsel %vm153_vm5, %v401_v50, %v418_v56  ;;  %v426_v58 = vsel %vm153_vm5, %v405_v51, %v425_v57 }
  0x7d   :  { %v250_v6 = vsel %vm153_vm5, %v229_v34, %v249_v46  ;;  %v163_v15 = vsel %vm155_vm6, %v142_v14, %v1153_v52  ;;  %v244_v7 = vsel %vm155_vm6, %v233_v54, %v243_v5  ;;  %v332_v16 = vsel %vm155_vm6, %v321_v63, %v331_v9 }
  0x7e   :  { %v251_v8 = vsel %vm155_vm6, %v237_v55, %v250_v6  ;;  %v339_v17 = vsel %vm155_vm6, %v325_v3, %v338_v4  ;;  %v420_v20 = vsel %vm155_vm6, %v409_v10, %v419_v12  ;;  %v427_v13 = vsel %vm155_vm6, %v413_v11, %v426_v58 }
  0x7f   :  { %v948_v51 = vmov 1966171168  }
  0x80   :  { %v590_v54 = vunpack.c.l.s4 %v948_v51 }
  0x82   :  { %v591_v55 = vunpack.c.0.s8 %v590_v54 }
  0x84   :  { %v594_v57 = vsub.s32 %v591_v55, %v1017_v38 }
  0xb8   :  { %v69_v60 = vpop.permute.xlu0 %68  ;;  %v260_v62 = vpop.permute.xlu1 %259 }
  0xb9   :  { %v166_v33 = vmul.f32 %v156_v0, %v69_v60  ;;  %v167_v21 = vmul.f32 %v163_v15, %v69_v60  ;;  %v342_v23 = vmul.f32 %v332_v16, %v260_v62  ;;  %v343_v14 = vmul.f32 %v339_v17, %v260_v62 }
  0xbd   :  { %v172_v18 = vpop.permute.xlu0 %171  ;;  %v348_v19 = vpop.permute.xlu1 %347 }
  0xbe   :  { %v254_v22 = vmul.f32 %v244_v7, %v172_v18  ;;  %v255_v40 = vmul.f32 %v251_v8, %v172_v18  ;;  %v430_v25 = vmul.f32 %v420_v20, %v348_v19  ;;  %v431_v26 = vmul.f32 %v427_v13, %v348_v19 }
  0xc0   :  { %v256_v52 = vadd.f32 %v254_v22, %v166_v33  ;;  %v257_v24 = vadd.f32 %v255_v40, %v167_v21 }
  0xc2   :  { %v344_v27 = vadd.f32 %v342_v23, %v256_v52  ;;  %v345_v28 = vadd.f32 %v343_v14, %v257_v24 }
  0xc4   :  { %v432_v29 = vadd.f32 %v430_v25, %v344_v27  ;;  %v433_v30 = vadd.f32 %v431_v26, %v345_v28 }
  0xc6   :  { %564 = vmatprep.mubr.f32.mxu0 %v433_v30 }
  0xc7   :  { %565 = vmatmul.mubr.f32.vlgmr.msra.gmra.mrb[0].mxu0 %v432_v29 }
 0x19a   :  { %v566_v34 = vpop.f32.mrb[0].mxu0 }
 0x19b   :  { %v571_v35 = vadd.f32 %v566_v34, %v434_v31  ;;  %v568_v36 = vpop.f32.mrb[1].mxu0 }
 0x19c   :  { %v572_v37 = vadd.f32 %v568_v36, %v435_v32 }
 0x19d   :  { %v751_v44 = vmul.f32 -1.442695, %v571_v35 }
 0x19e   :  { %v752_v45 = vmul.f32 -1.442695, %v572_v37 }
 0x19f   :  { %835 = vpow2.f32 %v751_v44 }
 0x1a0   :  { %837 = vpow2.f32 %v752_v45 }
 0x1a9   :  { %v836_v46 = vpop.eup %835 }
 0x1aa   :  { %v838_v47 = vpop.eup %837  ;;  %v579_v49 = vadd.f32 1.0, %v836_v46 }
 0x1ab   :  { %v580_v50 = vadd.f32 1.0, %v838_v47 }
 0x1ac   :  { %839 = vrcp.f32 %v579_v49 }
 0x1ad   :  { %841 = vrcp.f32 %v580_v50 }
 0x1b6   :  { %v840_v56 = vpop.eup %839 }
 0x1b7   :  { %v842_v60 = vpop.eup %841 }
 0x1b8   :  { %v587_v62 = vcombine.low %v840_v56, %v842_v60  ;;  %v588_v63 = vcombine.high %v840_v56, %v842_v60 }
 0x1ba   :  { %v595_v3 = vrot.slane %v587_v62, %v594_v57  ;;  %v602_v5 = vrot.slane %v588_v63, %v594_v57 }
 0x1bc   :  { %v603_v6 = vcombine.high %v595_v3, %v595_v3  ;;  %v604_v9 = vcombine.high %v602_v5, %v602_v5  ;;  %v611_v4 = vrot.slane %v595_v3, %v594_v57  ;;  %v618_v10 = vrot.slane %v602_v5, %v594_v57 }
 0x1be   :  { %v625_v11 = vrot.slane %v603_v6, %v594_v57  ;;  %v632_v12 = vrot.slane %v604_v9, %v594_v57  ;;  %v633_v58 = vcombine.high %v611_v4, %v611_v4  ;;  %v634_v0 = vcombine.high %v618_v10, %v618_v10 }
 0x1bf   :  { %v640_v15 = vrot.slane %v611_v4, %v1020_v39  ;;  %v644_v7 = vrot.slane %v611_v4, %v1071_v1  ;;  %v672_v8 = vrot.slane %v618_v10, %v1020_v39  ;;  %v676_v38 = vrot.slane %v618_v10, %v1071_v1 }
 0x1c0   :  { %v635_v16 = vcombine.high %v625_v11, %v625_v11  ;;  %v636_v17 = vcombine.high %v632_v12, %v632_v12  ;;  %v648_v18 = vrot.slane %v625_v11, %v1020_v39  ;;  %v652_v19 = vrot.slane %v625_v11, %v1071_v1 }
 0x1c1   :  { %v656_v20 = vrot.slane %v633_v58, %v1020_v39  ;;  %v660_v13 = vrot.slane %v633_v58, %v1071_v1  ;;  %v680_v33 = vrot.slane %v632_v12, %v1020_v39  ;;  %v684_v21 = vrot.slane %v632_v12, %v1071_v1 }
 0x1c2   :  { %v664_v22 = vrot.slane %v635_v16, %v1020_v39  ;;  %v668_v40 = vrot.slane %v635_v16, %v1071_v1  ;;  %v688_v23 = vrot.slane %v634_v0, %v1020_v39  ;;  %v692_v14 = vrot.slane %v634_v0, %v1071_v1 }
 0x1c3   :  { %v696_v52 = vrot.slane %v636_v17, %v1020_v39  ;;  %v700_v24 = vrot.slane %v636_v17, %v1071_v1  ;;  %v701_v25 = vcombine.low %v640_v15, %v644_v7  ;;  %v702_v26 = vcombine.low %v648_v18, %v652_v19 }
 0x1c4   :  { %v703_v27 = vcombine.low %v656_v20, %v660_v13  ;;  %v705_v28 = vcombine.low %v672_v8, %v676_v38  ;;  %v706_v29 = vcombine.low %v680_v33, %v684_v21  ;;  %v707_v30 = vcombine.low %v688_v23, %v692_v14 }
 0x1c5   :  { %v704_v31 = vcombine.low %v664_v22, %v668_v40  ;;  %v708_v32 = vcombine.low %v696_v52, %v700_v24  ;;  %v717_v34 = vmul.f32 %v701_v25, %v1025_v41  ;;  %v718_v35 = vmul.f32 %v702_v26, %v1027_v42 }
 0x1c6   :  { %v719_v36 = vmul.f32 %v703_v27, %v1029_v43  ;;  %v721_v39 = vmul.f32 %v705_v28, %v1047_v53  ;;  %v722_v1 = vmul.f32 %v706_v29, %v1058_v59  ;;  %v723_v37 = vmul.f32 %v707_v30, %v1062_v61 }
 0x1c7   :  { %v720_v44 = vmul.f32 %v704_v31, %v1039_v48  ;;  %v724_v45 = vmul.f32 %v708_v32, %v1073_v2  ;;  %725 = vst [vmem:[#allocation8] sm:$0xff] %v717_v34  ;;  %726 = vst [vmem:[#allocation8 + $0x8] sm:$0xff] %v718_v35 }
 0x1c8   :  { %727 = vst [vmem:[#allocation8 + $0x10] sm:$0xff] %v719_v36  ;;  %729 = vst [vmem:[#allocation8 + $0x20] sm:$0xff] %v721_v39 }
 0x1c9   :  { %730 = vst [vmem:[#allocation8 + $0x28] sm:$0xff] %v722_v1  ;;  %731 = vst [vmem:[#allocation8 + $0x30] sm:$0xff] %v723_v37 }
 0x1ca   :  { %728 = vst [vmem:[#allocation8 + $0x18] sm:$0xff] %v720_v44  ;;  %732 = vst [vmem:[#allocation8 + $0x38] sm:$0xff] %v724_v45 }
 0x1cb   :  { %920 = shalt.err (!%p917_p0)
}
 0x1cc   :  { %s921_s6 = scalar_lea.hbm %s1299_s4, 1024 }
 0x1cd   :  { %p922_p1 = scmp.ne.s32.totalorder %s1299_s4, %s921_s6  ;;  %p925_p2 = scmp.lt.u32.totalorder %s921_s6, %s1299_s4 }
 0x1cf   :  { %p927_p3 = pnand %p925_p2, %p922_p1 }
 0x1d1   :  { %930 = shalt.err (!%p927_p3)
}
 0x1d2   :  { %744 = dma.vmem_to_hbm [thread:$0]  %s739_s3, 1024, %s1299_s4, [#allocation4], %s942_s1, %s942_s1, %s943_s24  }
 0x1d3   :  { %935 = dma.done.wait [#allocation4], 1024  }
 0x1d4   :  { %936 = vsyncadd [#allocation4], 4294966272 }
 0x1d5   :  { %748 = vsyncpa [#allocation3], 1 }
 0x1d6   :  { %749 = vsyncpa [#allocation6], 1 }
 0x1d7   :  { %750 = vsyncpa [#allocation4], 1 }

</bundles_post_ra>
